<compile_context>
chip_gen: v6e
topology: v6e:2x2x1
jax: 0.10.0
libtpu: 0.0.40
codegen_flags: <defaults>
</compile_context>

<pallas_src>
import functools
import math

import jax
import jax.numpy as jnp
import numpy as np
from jax import lax
from jax.experimental import pallas as pl
from jax.experimental.pallas import tpu as pltpu

S_SCALE = 30.0
MARGIN = 0.5
CLAMP_EPS = 1e-7
NORM_EPS_SQ = 1e-24   # (F.normalize eps = 1e-12)**2, used under rsqrt
NEG_BIG = -1e30       # mask value for padded class columns / running-max init


def _round_up(v, m):
    return (v + m - 1) // m * m


def _arcface_kernel(xs_ref, wt_ref, labels_ref, out_ref,
                    m_scr, l_scr, tlog_scr,
                    *, n_batch, n_classes, s, inv_s, cos_m, sin_m, mask_cols):
    bi = pl.program_id(0)
    ci = pl.program_id(1)
    nc = pl.num_programs(1)
    b_tile = out_ref.shape[0]
    c_tile = wt_ref.shape[1]

    # ---- init running state once per batch tile (first class block) ----
    @pl.when(ci == 0)
    def _init():
        m_scr[...] = jnp.full_like(m_scr, NEG_BIG)
        l_scr[...] = jnp.zeros_like(l_scr)
        tlog_scr[...] = jnp.zeros_like(tlog_scr)

    # x is pre-normalized and pre-scaled by s; weight columns pre-normalized.
    # MXU matmul output IS the scaled cosine s*cos(theta), f32 accumulate.
    scos = jnp.dot(xs_ref[...], wt_ref[...], preferred_element_type=jnp.float32)
    cl = jnp.clip(scos, -s * (1.0 - CLAMP_EPS), s * (1.0 - CLAMP_EPS))   # (b_tile, c_tile)

    labels = labels_ref[...]                                             # (b_tile, 1) int32
    iota_c = lax.broadcasted_iota(jnp.int32, (1, c_tile), 1)
    class_ids = ci * c_tile + iota_c                                     # (1, c_tile)
    is_target = class_ids == labels                                      # (b_tile, c_tile) bool

    # ---- margin applied only to the target column (B sqrts, not BxC) ----
    tcos = jnp.sum(jnp.where(is_target, cl, 0.0), axis=1, keepdims=True) * inv_s
    sin_t = jnp.sqrt(jnp.maximum(1.0 - tcos * tcos, 0.0))
    t_logit = (tcos * cos_m - sin_t * sin_m) * s                         # (b_tile, 1)

    logits = jnp.where(is_target, t_logit, cl)
    if mask_cols:  # static: only compiled in when C % c_tile != 0
        logits = jnp.where(class_ids < n_classes, logits, NEG_BIG)

    # accumulate the (margined) target logit with a scalar range test
    # (at most one target per row per class block).
    c_lo = ci * c_tile
    has_t = (labels >= c_lo) & (labels < c_lo + c_tile)                  # (b_tile, 1)
    tlog_scr[...] += jnp.where(has_t, t_logit, 0.0)

    # ---- online log-sum-exp over class blocks ----
    m_prev = m_scr[...]
    m_new = jnp.maximum(m_prev, jnp.max(logits, axis=1, keepdims=True))
    alpha = jnp.exp(m_prev - m_new)
    l_scr[...] = alpha * l_scr[...] + jnp.sum(jnp.exp(logits - m_new), axis=1, keepdims=True)
    m_scr[...] = m_new

    # ---- finalize per-example loss on the last class block ----
    @pl.when(ci == nc - 1)
    def _finalize():
        lse = m_scr[...] + jnp.log(l_scr[...])
        per_row = lse - tlog_scr[...]
        row_ids = bi * b_tile + lax.broadcasted_iota(jnp.int32, (b_tile, 1), 0)
        out_ref[...] = jnp.where(row_ids < n_batch, per_row, 0.0)


def arcface_loss_pallas(x, weight, labels, *, s=S_SCALE, m=MARGIN,
                        matmul_dtype=jnp.bfloat16, b_tile=None, c_tile=None):
    """x: (B, D) f32, weight: (C, D) f32, labels: (B,) int -> scalar f32 loss."""
    B, D = x.shape
    C, D2 = weight.shape
    assert D == D2

    # ---- tile selection ------------------------------------------------------
    if c_tile is None:
        # multiple of 256 (512) keeps the v6e/v7x MXU full; clamp for tiny C.
        c_tile = 512 if C >= 512 else _round_up(C, 128)
    if b_tile is None:
        # Larger batch tile => fewer re-streams of the bf16 weight matrix
        # (the HBM roofline, especially on v5e).
        b_tile = 256 if B >= 256 else _round_up(B, 8)
        # v7x has 2 TensorCores per chip: make sure the "parallel" batch axis
        # has >= 2 tiles so both cores get work (extra weight re-stream is
        # cheap there at ~3.2 TB/s HBM).
        try:
            kind = jax.devices()[0].device_kind.lower()
            if "v7" in kind and B >= 128:
                b_tile = min(b_tile, max(8, _round_up(-(-B // 2), 8)))
        except Exception:
            pass
    b_tile = max(8, _round_up(b_tile, 8))
    c_tile = max(128, _round_up(c_tile, 128))

    b_pad = _round_up(B, b_tile)
    c_pad = _round_up(C, c_tile)
    mask_cols = (c_pad != C)

    # ---- pre-normalize in f32 in the wrapper (review items 1 & 2) -----------
    x32 = x.astype(jnp.float32)
    inv_xn = lax.rsqrt(jnp.maximum(jnp.sum(x32 * x32, axis=1, keepdims=True), NORM_EPS_SQ))
    xs = x32 * (inv_xn * jnp.float32(s))                 # fold scale s into x
    xs_p = jnp.pad(xs.astype(matmul_dtype), ((0, b_pad - B), (0, 0)))

    w32 = weight.astype(jnp.float32)
    inv_wn = lax.rsqrt(jnp.maximum(jnp.sum(w32 * w32, axis=1, keepdims=True), NORM_EPS_SQ))
    wt_p = jnp.pad((w32 * inv_wn).T.astype(matmul_dtype), ((0, 0), (0, c_pad - C)))

    labels_p = jnp.pad(labels.astype(jnp.int32).reshape(-1, 1), ((0, b_pad - B), (0, 0)))

    n_b = b_pad // b_tile
    n_c = c_pad // c_tile

    # ---- VMEM budget: actual working set + headroom, clamped to physical ----
    itemsize = jnp.dtype(matmul_dtype).itemsize
    working = (2 * b_tile * D * itemsize          # x tile (double-buffered)
               + 2 * D * c_tile * itemsize        # weight tile (double-buffered)
               + 4 * b_tile * 4 + 4 * b_tile * 4  # labels / out blocks
               + 3 * b_tile * 4                   # scratch (m, l, tlog)
               + 4 * b_tile * c_tile * 4)         # f32 logit-sized temps
    try:
        phys = pltpu.get_tpu_info().vmem_capacity_bytes
    except Exception:
        phys = 64 * 1024 * 1024                   # conservative (v7x per-core)
    vmem_limit = min(max(working + (8 << 20), 32 << 20), phys - (16 << 20))

    kernel = functools.partial(
        _arcface_kernel,
        n_batch=B, n_classes=C,
        s=float(s), inv_s=float(1.0 / s),
        cos_m=float(math.cos(m)), sin_m=float(math.sin(m)),
        mask_cols=mask_cols)

    per_row = pl.pallas_call(
        kernel,
        out_shape=jax.ShapeDtypeStruct((b_pad, 1), jnp.float32),
        grid_spec=pltpu.PrefetchScalarGridSpec(
            num_scalar_prefetch=0,
            grid=(n_b, n_c),
            in_specs=[
                pl.BlockSpec((b_tile, D), lambda bi, ci: (bi, 0)),   # x tile (resident over ci)
                pl.BlockSpec((D, c_tile), lambda bi, ci: (0, ci)),   # streamed weight tile
                pl.BlockSpec((b_tile, 1), lambda bi, ci: (bi, 0)),   # labels tile
            ],
            out_specs=pl.BlockSpec((b_tile, 1), lambda bi, ci: (bi, 0)),
            scratch_shapes=[
                pltpu.VMEM((b_tile, 1), jnp.float32),   # running max
                pltpu.VMEM((b_tile, 1), jnp.float32),   # running sum exp
                pltpu.VMEM((b_tile, 1), jnp.float32),   # target logit
            ]),
        compiler_params=pltpu.CompilerParams(
            dimension_semantics=("parallel", "arbitrary"),
            vmem_limit_bytes=int(vmem_limit)),
    )(xs_p, wt_p, labels_p)

    return jnp.sum(per_row) / jnp.float32(B)


def arcface_loss_ref(x, weight, labels, s=S_SCALE, m=MARGIN):
    """Pure-JAX reference mirroring the PyTorch module (arccos formulation)."""
    xn = x / jnp.maximum(jnp.linalg.norm(x, axis=1, keepdims=True), 1e-12)
    wn = weight / jnp.maximum(jnp.linalg.norm(weight, axis=1, keepdims=True), 1e-12)
    cosine = xn @ wn.T
    theta = jnp.arccos(jnp.clip(cosine, -1.0 + CLAMP_EPS, 1.0 - CLAMP_EPS))
    one_hot = jax.nn.one_hot(labels, weight.shape[0], dtype=jnp.float32)
    logits = jnp.cos(one_hot * (theta + m) + (1.0 - one_hot) * theta) * s
    logp = jax.nn.log_softmax(logits, axis=1)
    return -jnp.mean(jnp.sum(one_hot * logp, axis=1))


if __name__ == "__main__":
    def make_case(key, B, D, C):
        kx, kw, kl = jax.random.split(key, 3)
        x = jax.random.normal(kx, (B, D), dtype=jnp.float32)
        limit = math.sqrt(6.0 / (D + C))  # xavier_uniform_ for (C, D) weight
        w = jax.random.uniform(kw, (C, D), minval=-limit, maxval=limit, dtype=jnp.float32)
        lab = jax.random.randint(kl, (B,), 0, C, dtype=jnp.int32)
        return x, w, lab

    key = jax.random.PRNGKey(0)
    k1, k2 = jax.random.split(key)

    # Case 1: small shapes implied by the module (batch=8, in_features=32, out_features=16).
    x, w, lab = make_case(k1, 8, 32, 16)
    ref = arcface_loss_ref(x, w, lab)
    got_f32 = jax.block_until_ready(arcface_loss_pallas(x, w, lab, matmul_dtype=jnp.float32))
    got_bf16 = jax.block_until_ready(arcface_loss_pallas(x, w, lab, matmul_dtype=jnp.bfloat16))
    np.testing.assert_allclose(np.asarray(got_f32), np.asarray(ref), rtol=5e-4, atol=5e-4)
    np.testing.assert_allclose(np.asarray(got_bf16), np.asarray(ref), rtol=5e-2, atol=5e-2)

    # Case 2: exercises the tiled grid (batch & class padding, online LSE across 3 class blocks,
    # padded-column masking path).
    x2, w2, lab2 = make_case(k2, 72, 64, 300)
    ref2 = arcface_loss_ref(x2, w2, lab2)
    got2_f32 = jax.block_until_ready(
        arcface_loss_pallas(x2, w2, lab2, matmul_dtype=jnp.float32, b_tile=32, c_tile=128))
    got2_bf16 = jax.block_until_ready(
        arcface_loss_pallas(x2, w2, lab2, matmul_dtype=jnp.bfloat16, b_tile=32, c_tile=128))
    np.testing.assert_allclose(np.asarray(got2_f32), np.asarray(ref2), rtol=5e-4, atol=5e-4)
    np.testing.assert_allclose(np.asarray(got2_bf16), np.asarray(ref2), rtol=5e-2, atol=5e-2)

    # Case 3: evenly-tiled class axis (mask_cols=False fast path).
    x3, w3, lab3 = make_case(k1, 48, 64, 256)
    ref3 = arcface_loss_ref(x3, w3, lab3)
    got3 = jax.block_until_ready(
        arcface_loss_pallas(x3, w3, lab3, matmul_dtype=jnp.bfloat16, b_tile=16, c_tile=128))
    np.testing.assert_allclose(np.asarray(got3), np.asarray(ref3), rtol=5e-2, atol=5e-2)

    print("KERNEL_OK")
</pallas_src>

<mosaic_0001>
module attributes {stable_mosaic.version = 11 : i64} {
  func.func @_arcface_kernel(%arg0: i32, %arg1: i32, %arg2: memref<8x32xf32, #tpu.memory_space<vmem>>, %arg3: memref<32x128xf32, #tpu.memory_space<vmem>>, %arg4: memref<8x1xi32, #tpu.memory_space<vmem>>, %arg5: memref<8x1xf32, #tpu.memory_space<vmem>>, %arg6: memref<8x1xf32, #tpu.memory_space<vmem>>, %arg7: memref<8x1xf32, #tpu.memory_space<vmem>>, %arg8: memref<8x1xf32, #tpu.memory_space<vmem>>) attributes {dimension_semantics = [#tpu.dimension_semantics<parallel>, #tpu.dimension_semantics<arbitrary>], iteration_bounds = array<i64: 1, 1>, scalar_prefetch = 0 : i64, scratch_operands = 3 : i64, tpu.core_type = #tpu.core_type<tc>, window_params = [{transform_indices = @transform_0, window_bounds = array<i64: 8, 32>}, {transform_indices = @transform_1, window_bounds = array<i64: 32, 128>}, {transform_indices = @transform_2, window_bounds = array<i64: 8, 1>}, {transform_indices = @transform_3, window_bounds = array<i64: 8, 1>}]} {
    %c0_i32 = arith.constant 0 : i32
    %0 = arith.cmpi eq, %arg1, %c0_i32 : i32
    %1 = arith.extui %0 : i1 to i32
    %c0_i32_0 = arith.constant 0 : i32
    %2 = arith.cmpi ne, %1, %c0_i32_0 : i32
    scf.if %2 {
      %cst_36 = arith.constant -1.000000e+30 : f32
      %77 = vector.broadcast %cst_36 : f32 to vector<8x1xf32>
      %c0_37 = arith.constant 0 : index
      %c0_38 = arith.constant 0 : index
      %78 = vector.load %arg6[%c0_37, %c0_38] : memref<8x1xf32, #tpu.memory_space<vmem>>, vector<8x1xf32>
      tpu.vector_store %arg6[%c0_37, %c0_38], %77 {strides = array<i32>} : memref<8x1xf32, #tpu.memory_space<vmem>>, vector<8x1xf32>,
      %cst_39 = arith.constant 0.000000e+00 : f32
      %79 = vector.broadcast %cst_39 : f32 to vector<8x1xf32>
      %c0_40 = arith.constant 0 : index
      %c0_41 = arith.constant 0 : index
      %80 = vector.load %arg7[%c0_40, %c0_41] : memref<8x1xf32, #tpu.memory_space<vmem>>, vector<8x1xf32>
      tpu.vector_store %arg7[%c0_40, %c0_41], %79 {strides = array<i32>} : memref<8x1xf32, #tpu.memory_space<vmem>>, vector<8x1xf32>,
      %cst_42 = arith.constant 0.000000e+00 : f32
      %81 = vector.broadcast %cst_42 : f32 to vector<8x1xf32>
      %c0_43 = arith.constant 0 : index
      %c0_44 = arith.constant 0 : index
      %82 = vector.load %arg8[%c0_43, %c0_44] : memref<8x1xf32, #tpu.memory_space<vmem>>, vector<8x1xf32>
      tpu.vector_store %arg8[%c0_43, %c0_44], %81 {strides = array<i32>} : memref<8x1xf32, #tpu.memory_space<vmem>>, vector<8x1xf32>,
    } else {
    }
    %c0 = arith.constant 0 : index
    %c0_1 = arith.constant 0 : index
    %3 = vector.load %arg2[%c0, %c0_1] : memref<8x32xf32, #tpu.memory_space<vmem>>, vector<8x32xf32>
    %c0_2 = arith.constant 0 : index
    %c0_3 = arith.constant 0 : index
    %4 = vector.load %arg3[%c0_2, %c0_3] : memref<32x128xf32, #tpu.memory_space<vmem>>, vector<32x128xf32>
    %cst = arith.constant dense<0.000000e+00> : vector<8x128xf32>
    %5 = tpu.matmul %3, %4, %cst {dimension_numbers = #tpu.dot_dimension_numbers<[1], [0], [0], [1], [0, 0, 1, 1], [], []>} : vector<8x32xf32>, vector<32x128xf32>, vector<8x128xf32> -> vector<8x128xf32>
    %cst_4 = arith.constant -29.9999962 : f32
    %cst_5 = arith.constant 29.9999962 : f32
    %6 = vector.broadcast %cst_4 : f32 to vector<8x128xf32>
    %7 = arith.maximumf %6, %5 : vector<8x128xf32>
    %8 = vector.broadcast %cst_5 : f32 to vector<8x128xf32>
    %9 = arith.minimumf %8, %7 : vector<8x128xf32>
    %c0_6 = arith.constant 0 : index
    %c0_7 = arith.constant 0 : index
    %10 = vector.load %arg4[%c0_6, %c0_7] : memref<8x1xi32, #tpu.memory_space<vmem>>, vector<8x1xi32>
    %11 = tpu.iota {dimensions = array<i32: 1>} : vector<1x128xi32>
    %c128_i32 = arith.constant 128 : i32
    %12 = arith.muli %arg1, %c128_i32 : i32
    %13 = vector.broadcast %12 : i32 to vector<1x128xi32>
    %14 = arith.addi %13, %11 : vector<1x128xi32>
    %15 = vector.broadcast %14 : vector<1x128xi32> to vector<8x128xi32>
    %16 = vector.broadcast %10 : vector<8x1xi32> to vector<8x128xi32>
    %17 = arith.cmpi eq, %15, %16 : vector<8x128xi32>
    %cst_8 = arith.constant 0.000000e+00 : f32
    %18 = vector.broadcast %cst_8 : f32 to vector<8x128xf32>
    %19 = arith.select %17, %9, %18 : vector<8x128xi1>, vector<8x128xf32>
    %cst_9 = arith.constant dense<0.000000e+00> : vector<8xf32>
    %20 = vector.multi_reduction <add>, %19, %cst_9 [1] : vector<8x128xf32> to vector<8xf32>
    %21 = vector.shape_cast %20 : vector<8xf32> to vector<8x1xf32>
    %cst_10 = arith.constant 0.0333333351 : f32
    %22 = vector.broadcast %cst_10 : f32 to vector<8x1xf32>
    %23 = arith.mulf %21, %22 : vector<8x1xf32>
    %24 = arith.mulf %23, %23 : vector<8x1xf32>
    %cst_11 = arith.constant 1.000000e+00 : f32
    %25 = vector.broadcast %cst_11 : f32 to vector<8x1xf32>
    %26 = arith.subf %25, %24 : vector<8x1xf32>
    %cst_12 = arith.constant 0.000000e+00 : f32
    %27 = vector.broadcast %cst_12 : f32 to vector<8x1xf32>
    %28 = arith.maximumf %26, %27 : vector<8x1xf32>
    %29 = math.sqrt %28 : vector<8x1xf32>
    %cst_13 = arith.constant 0.87758255 : f32
    %30 = vector.broadcast %cst_13 : f32 to vector<8x1xf32>
    %31 = arith.mulf %23, %30 : vector<8x1xf32>
    %cst_14 = arith.constant 0.47942555 : f32
    %32 = vector.broadcast %cst_14 : f32 to vector<8x1xf32>
    %33 = arith.mulf %29, %32 : vector<8x1xf32>
    %34 = arith.subf %31, %33 : vector<8x1xf32>
    %cst_15 = arith.constant 3.000000e+01 : f32
    %35 = vector.broadcast %cst_15 : f32 to vector<8x1xf32>
    %36 = arith.mulf %34, %35 : vector<8x1xf32>
    %37 = vector.shape_cast %36 : vector<8x1xf32> to vector<8x1xf32>
    %38 = vector.broadcast %37 : vector<8x1xf32> to vector<8x128xf32>
    %39 = arith.select %17, %38, %9 : vector<8x128xi1>, vector<8x128xf32>
    %c16_i32 = arith.constant 16 : i32
    %40 = vector.broadcast %c16_i32 : i32 to vector<1x128xi32>
    %41 = arith.cmpi slt, %14, %40 : vector<1x128xi32>
    %cst_16 = arith.constant -1.000000e+30 : f32
    %42 = vector.shape_cast %41 : vector<1x128xi1> to vector<1x128xi1>
    %43 = vector.broadcast %42 : vector<1x128xi1> to vector<8x128xi1>
    %44 = vector.broadcast %cst_16 : f32 to vector<8x128xf32>
    %45 = arith.select %43, %39, %44 : vector<8x128xi1>, vector<8x128xf32>
    %c128_i32_17 = arith.constant 128 : i32
    %46 = arith.muli %arg1, %c128_i32_17 : i32
    %47 = vector.broadcast %46 : i32 to vector<8x1xi32>
    %48 = arith.cmpi sge, %10, %47 : vector<8x1xi32>
    %c128_i32_18 = arith.constant 128 : i32
    %49 = arith.addi %46, %c128_i32_18 : i32
    %50 = vector.broadcast %49 : i32 to vector<8x1xi32>
    %51 = arith.cmpi slt, %10, %50 : vector<8x1xi32>
    %52 = arith.andi %48, %51 : vector<8x1xi1>
    %c0_19 = arith.constant 0 : index
    %c0_20 = arith.constant 0 : index
    %53 = vector.load %arg8[%c0_19, %c0_20] : memref<8x1xf32, #tpu.memory_space<vmem>>, vector<8x1xf32>
    %cst_21 = arith.constant 0.000000e+00 : f32
    %54 = vector.broadcast %cst_21 : f32 to vector<8x1xf32>
    %55 = arith.select %52, %36, %54 : vector<8x1xi1>, vector<8x1xf32>
    %56 = arith.addf %53, %55 : vector<8x1xf32>
    %c0_22 = arith.constant 0 : index
    %c0_23 = arith.constant 0 : index
    %57 = vector.load %arg8[%c0_22, %c0_23] : memref<8x1xf32, #tpu.memory_space<vmem>>, vector<8x1xf32>
    tpu.vector_store %arg8[%c0_22, %c0_23], %56 {strides = array<i32>} : memref<8x1xf32, #tpu.memory_space<vmem>>, vector<8x1xf32>,
    %c0_24 = arith.constant 0 : index
    %c0_25 = arith.constant 0 : index
    %58 = vector.load %arg6[%c0_24, %c0_25] : memref<8x1xf32, #tpu.memory_space<vmem>>, vector<8x1xf32>
    %cst_26 = arith.constant dense<0xFF800000> : vector<8xf32>
    %59 = vector.multi_reduction <maximumf>, %45, %cst_26 [1] : vector<8x128xf32> to vector<8xf32>
    %60 = vector.shape_cast %59 : vector<8xf32> to vector<8x1xf32>
    %61 = arith.maximumf %58, %60 : vector<8x1xf32>
    %62 = arith.subf %58, %61 : vector<8x1xf32>
    %63 = math.exp %62 : vector<8x1xf32>
    %c0_27 = arith.constant 0 : index
    %c0_28 = arith.constant 0 : index
    %64 = vector.load %arg7[%c0_27, %c0_28] : memref<8x1xf32, #tpu.memory_space<vmem>>, vector<8x1xf32>
    %65 = arith.mulf %63, %64 : vector<8x1xf32>
    %66 = vector.broadcast %61 : vector<8x1xf32> to vector<8x128xf32>
    %67 = arith.subf %45, %66 : vector<8x128xf32>
    %68 = math.exp %67 : vector<8x128xf32>
    %cst_29 = arith.constant dense<0.000000e+00> : vector<8xf32>
    %69 = vector.multi_reduction <add>, %68, %cst_29 [1] : vector<8x128xf32> to vector<8xf32>
    %70 = vector.shape_cast %69 : vector<8xf32> to vector<8x1xf32>
    %71 = arith.addf %65, %70 : vector<8x1xf32>
    %c0_30 = arith.constant 0 : index
    %c0_31 = arith.constant 0 : index
    %72 = vector.load %arg7[%c0_30, %c0_31] : memref<8x1xf32, #tpu.memory_space<vmem>>, vector<8x1xf32>
    tpu.vector_store %arg7[%c0_30, %c0_31], %71 {strides = array<i32>} : memref<8x1xf32, #tpu.memory_space<vmem>>, vector<8x1xf32>,
    %c0_32 = arith.constant 0 : index
    %c0_33 = arith.constant 0 : index
    %73 = vector.load %arg6[%c0_32, %c0_33] : memref<8x1xf32, #tpu.memory_space<vmem>>, vector<8x1xf32>
    tpu.vector_store %arg6[%c0_32, %c0_33], %61 {strides = array<i32>} : memref<8x1xf32, #tpu.memory_space<vmem>>, vector<8x1xf32>,
    %c0_i32_34 = arith.constant 0 : i32
    %74 = arith.cmpi eq, %arg1, %c0_i32_34 : i32
    %75 = arith.extui %74 : i1 to i32
    %c0_i32_35 = arith.constant 0 : i32
    %76 = arith.cmpi ne, %75, %c0_i32_35 : i32
    scf.if %76 {
      %c0_36 = arith.constant 0 : index
      %c0_37 = arith.constant 0 : index
      %77 = vector.load %arg6[%c0_36, %c0_37] : memref<8x1xf32, #tpu.memory_space<vmem>>, vector<8x1xf32>
      %c0_38 = arith.constant 0 : index
      %c0_39 = arith.constant 0 : index
      %78 = vector.load %arg7[%c0_38, %c0_39] : memref<8x1xf32, #tpu.memory_space<vmem>>, vector<8x1xf32>
      %79 = math.log %78 : vector<8x1xf32>
      %80 = arith.addf %77, %79 : vector<8x1xf32>
      %c0_40 = arith.constant 0 : index
      %c0_41 = arith.constant 0 : index
      %81 = vector.load %arg8[%c0_40, %c0_41] : memref<8x1xf32, #tpu.memory_space<vmem>>, vector<8x1xf32>
      %82 = arith.subf %80, %81 : vector<8x1xf32>
      %c8_i32 = arith.constant 8 : i32
      %83 = arith.muli %arg0, %c8_i32 : i32
      %84 = tpu.iota {dimensions = array<i32: 0>} : vector<8x1xi32>
      %85 = vector.broadcast %83 : i32 to vector<8x1xi32>
      %86 = arith.addi %85, %84 : vector<8x1xi32>
      %c8_i32_42 = arith.constant 8 : i32
      %87 = vector.broadcast %c8_i32_42 : i32 to vector<8x1xi32>
      %88 = arith.cmpi slt, %86, %87 : vector<8x1xi32>
      %cst_43 = arith.constant 0.000000e+00 : f32
      %89 = vector.broadcast %cst_43 : f32 to vector<8x1xf32>
      %90 = arith.select %88, %82, %89 : vector<8x1xi1>, vector<8x1xf32>
      %c0_44 = arith.constant 0 : index
      %c0_45 = arith.constant 0 : index
      %91 = vector.load %arg5[%c0_44, %c0_45] : memref<8x1xf32, #tpu.memory_space<vmem>>, vector<8x1xf32>
      tpu.vector_store %arg5[%c0_44, %c0_45], %90 {strides = array<i32>} : memref<8x1xf32, #tpu.memory_space<vmem>>, vector<8x1xf32>,
    } else {
    }
    return
  }
  func.func @transform_0(%arg0: i32, %arg1: i32) -> (i32, i32) {
    %c0_i32 = arith.constant 0 : i32
    %c0_i32_0 = arith.constant 0 : i32
    return %arg0, %c0_i32 : i32, i32
  }
  func.func @transform_1(%arg0: i32, %arg1: i32) -> (i32, i32) {
    %c0_i32 = arith.constant 0 : i32
    %c0_i32_0 = arith.constant 0 : i32
    return %c0_i32, %arg1 : i32, i32
  }
  func.func @transform_2(%arg0: i32, %arg1: i32) -> (i32, i32) {
    %c0_i32 = arith.constant 0 : i32
    %c0_i32_0 = arith.constant 0 : i32
    return %arg0, %c0_i32 : i32, i32
  }
  func.func @transform_3(%arg0: i32, %arg1: i32) -> (i32, i32) {
    %c0_i32 = arith.constant 0 : i32
    %c0_i32_0 = arith.constant 0 : i32
    return %arg0, %c0_i32 : i32, i32
  }
}

</mosaic_0001>

<bundles_post_ra>
// kernel: tpu_custom_call.1
= control target key start
LH: loop header
LB: loop body
LE: loop exit
PB: predicated region body
PF: predicated region fallthrough
CT: control target
= control target key end

     0   :  { %8 = vsyncpa [#allocation6], 0  ;;  %s262_s12 = smov [#allocation5]   ;;  %s310_s0 = inlined_call_operand.vmem [shape: f32[8,32], index: 0, kind: input, shape index: {}]   ;;  %s311_s1 = inlined_call_operand.hbm [shape: f32[32,128], index: 1, kind: input, shape index: {}]   ;;  %s312_s2 = inlined_call_operand.vmem [shape: s32[8,1], index: 2, kind: input, shape index: {}]   ;;  %s313_s3 = inlined_call_operand.vmem [shape: f32[8,1], index: 3, kind: output, shape index: {}]  }
   0x1   :  { %s16_s13 = sshll.u32 %s262_s12, 4  ;;  %s17_s13 = int_to_ptr.vmem [resolvable:$true] %s16_s13 }
   0x2   :  { %s248_s14 = scalar_lea.vmem %s17_s13, 512  ;;  %p253_p1 = scmp.lt.s32.totalorder %s17_s13, %s17_s13 }
   0x3   :  { %p249_p0 = scmp.ne.s32.totalorder %s17_s13, %s248_s14  ;;  %p254_p2 = scmp.lt.s32.totalorder %s248_s14, %s248_s14 }
   0x5   :  { %p255_p3 = por %p254_p2, %p253_p1 }
   0x7   :  { %p256_p4 = pnand %p255_p3, %p249_p0 }
   0x9   :  { %259 = shalt.err (!%p256_p4)
}
   0xa   :  { %s263_s15 = smov 128   ;;  %s264_s16 = smov 8  }
   0xb   :  { %22 = dma.hbm_to_vmem [thread:$0]  %s311_s1, 512, %s17_s13, [#allocation6], %s263_s15, %s263_s15, %s264_s16  }
   0xc   :  { %260 = dma.done.wait [#allocation6], 512  }
   0xd   :  { %261 = vsyncadd [#allocation6], 4294966784  ;;  %v265_v0 = vmov 0.0   ;;  %vm266_vm0 = vmmov 0   ;;  %v267_v1 = vmov 0   ;;  %v40_v2 = vld [vmem:[#allocation5 + $0x18] sm:$0xff]  ;;  %v118_v8 = vlaneseq }
   0xe   :  { %212 = vmatprep.subr.mxu0 %v265_v0  ;;  %220 = vmatprep.mubr.msk.f32.mxu0 %vm266_vm0, %v265_v0  ;;  %v39_v3 = vld [vmem:[#allocation5 + $0x10] sm:$0xff]  ;;  %v117_v4 = vld [vmem:[%s312_s2] sm:$0xff]  ;;  %v37_v6 = vld [vmem:[#allocation5] sm:$0xff]  ;;  %vm41_vm1 = vcmask 261120   ;;  %vm32_vm2 = vcmask 7168  }
   0xf   :  { %230 = vset.pattern.permute.xlu0 %v267_v1  ;;  %231 = vset.pattern.permute.xlu1 %v267_v1  ;;  %v38_v5 = vld [vmem:[#allocation5 + $0x8] sm:$0xff]  ;;  %35 = vst.msk [vmem:[#allocation4] sm:$0xff] %vm32_vm2, %v265_v0  ;;  %34 = vst.msk [vmem:[#allocation3] sm:$0xff] %vm32_vm2, %v265_v0  ;;  %v119_v9 = vand.u32 127, %v118_v8  ;;  %v268_v15 = vmov -1e+30  }
  0x10   :  { %213 = vmatpush3.msra.mxu0 %v40_v2  ;;  %124 = vperm.xlu0 %230, %v117_v4   ;;  %v36_v7 = vld [vmem:[%s310_s0] sm:$0xff]  ;;  %33 = vst.msk [vmem:[#allocation2] sm:$0xff] %vm32_vm2, %v268_v15  ;;  %vm150_vm6 = vcmp.ge.s32.totalorder %v117_v4, 0  ;;  %vm153_vm7 = vcmp.lt.s32.totalorder %v117_v4, 128 }
  0x11   :  { %214 = vmatprep.subr.mxu0 %v265_v0  ;;  %vm154_vm8 = vmand %vm150_vm6, %vm153_vm7  ;;  %vm146_vm9 = vcmp.lt.s32.totalorder %v119_v9, 16 }
  0x12   :  { %215 = vmatpush3.msra.mxu0 %v39_v3 }
  0x13   :  { %216 = vmatprep.subr.mxu0 %v265_v0 }
  0x14   :  { %217 = vmatpush3.msra.mxu0 %v38_v5 }
  0x15   :  { %218 = vmatprep.subr.mxu0 %v265_v0 }
  0x16   :  { %219 = vmatpush3.msra.mxu0 %v37_v6  ;;  %v155_v30 = vld [vmem:[#allocation4] sm:$0xff]  ;;  %v167_v45 = vld [vmem:[#allocation3] sm:$0xff] }
  0x17   :  { %221 = vmatmul.mubr.msk.f32.vlgmr.msra.gmra.mxu0 %vm41_vm1, %v36_v7  ;;  %v160_v35 = vld [vmem:[#allocation2] sm:$0xff] }
  0x8b   :  { %v125_v10 = vpop.permute.xlu0 %124 }
  0x8c   :  { %vm126_vm3 = vcmp.eq.s32.totalorder %v119_v9, %v125_v10 }
  0xd7   :  { %v111_v11 = vpop.f32.mrf.mxu0 }
  0xd8   :  { %v206_v12 = vclamps-f32 %v111_v11, 29.999996 }
  0xd9   :  { %v222_v13 = vpop.f32.mrf.mxu0 }
  0xda   :  { %v127_v14 = vsel %vm126_vm3, %v206_v12, 0.0 }
  0xdb   :  { %128 = vadd.xlane.f32.xlu0 %v127_v14 }
 0x164   :  { %v129_v16 = vpop.xlane.xlu0 %128 }
 0x165   :  { %v130_v17 = vmul.f32 0.033333335, %v129_v16 }
 0x167   :  { %v131_v18 = vmul.f32 %v130_v17, %v130_v17  ;;  %v141_v26 = vmul.f32 0.87758255, %v130_v17 }
 0x169   :  { %v132_v19 = vsub.f32 1.0, %v131_v18 }
 0x16b   :  { %v133_v20 = vmax.f32 %v132_v19, 0.0 }
 0x16d   :  { %232 = vrsqrt.f32 %v133_v20  ;;  %vm136_vm4 = vcmp.eq.f32.partialorder %v133_v20, inf  ;;  %v139_v23 = vand.u32 2147483648, %v133_v20  ;;  %vm138_vm5 = vcmp.eq.f32.partialorder %v133_v20, 0.0 }
 0x17a   :  { %v233_v21 = vpop.eup %232 }
 0x17b   :  { %v135_v22 = vmul.f32 %v233_v21, %v133_v20 }
 0x17d   :  { %v137_v24 = vsel %vm136_vm4, %v133_v20, %v135_v22 }
 0x17e   :  { %v140_v25 = vsel %vm138_vm5, %v139_v23, %v137_v24 }
 0x17f   :  { %v142_v27 = vmul.f32 0.47942555, %v140_v25 }
 0x181   :  { %v143_v28 = vsub.f32 %v141_v26, %v142_v27 }
 0x183   :  { %v144_v29 = vmul.f32 30.0, %v143_v28 }
 0x185   :  { %v156_v31 = vsel %vm154_vm8, %v144_v29, 0.0  ;;  %v145_v32 = vsel %vm126_vm3, %v144_v29, %v206_v12 }
 0x186   :  { %v157_v33 = vadd.f32 %v156_v31, %v155_v30  ;;  %v149_v34 = vsel %vm146_vm9, %v145_v32, -1e+30 }
 0x187   :  { %161 = vmax.xlane.f32.xlu1 %v149_v34 }
 0x188   :  { %159 = vst.msk [vmem:[#allocation4] sm:$0xff] %vm32_vm2, %v157_v33 }
 0x18f   :  { %v190_v54 = vld [vmem:[#allocation4] sm:$0xff] }
 0x210   :  { %v162_v36 = vpop.xlane.xlu1 %161 }
 0x211   :  { %v163_v37 = vmax.f32 %v160_v35, %v162_v36 }
 0x213   :  { %v164_v38 = vsub.f32 %v160_v35, %v163_v37  ;;  %181 = vst.msk [vmem:[#allocation2] sm:$0xff] %vm32_vm2, %v163_v37  ;;  %171 = vperm.xlu1 %231, %v163_v37  }
 0x215   :  { %v165_v43 = vmul.f32 1.442695, %v164_v38 }
 0x21a   :  { %v185_v52 = vld [vmem:[#allocation2] sm:$0xff] }
 0x28e   :  { %v172_v39 = vpop.permute.xlu1 %171 }
 0x28f   :  { %v174_v40 = vsub.f32 %v149_v34, %v172_v39 }
 0x291   :  { %v175_v41 = vmul.f32 1.442695, %v174_v40 }
 0x293   :  { %234 = vpow2.f32 %v175_v41 }
 0x294   :  { %236 = vpow2.f32 %v165_v43 }
 0x2a0   :  { %v235_v42 = vpop.eup %234 }
 0x2a1   :  { %177 = vadd.xlane.f32.xlu1 %v235_v42  ;;  %v237_v44 = vpop.eup %236 }
 0x2a2   :  { %v168_v46 = vmul.f32 %v237_v44, %v167_v45 }
 0x32a   :  { %v178_v47 = vpop.xlane.xlu1 %177 }
 0x32b   :  { %v179_v48 = vadd.f32 %v178_v47, %v168_v46 }
 0x32d   :  { %180 = vst.msk [vmem:[#allocation3] sm:$0xff] %vm32_vm2, %v179_v48 }
 0x334   :  { %v186_v49 = vld [vmem:[#allocation3] sm:$0xff] }
 0x335   :  { %238 = vlog2.f32 %v186_v49 }
 0x342   :  { %v239_v50 = vpop.eup %238 }
 0x343   :  { %v188_v51 = vmul.f32 0.6931472, %v239_v50 }
 0x345   :  { %v189_v53 = vadd.f32 %v188_v51, %v185_v52 }
 0x347   :  { %v191_v55 = vsub.f32 %v189_v53, %v190_v54 }
 0x349   :  { %199 = vst.msk [vmem:[%s313_s3] sm:$0xff] %vm32_vm2, %v191_v55 }
 0x34a   :  { %204 = vsyncpa [#allocation6], 1 }

</bundles_post_ra>
